<compile_context>
chip_gen: v7x
topology: tpu7x:2x2x1
jax: 0.10.0
libtpu: 0.0.40
codegen_flags: <defaults>
</compile_context>

<pallas_src>
import functools

import jax
import jax.numpy as jnp
from jax import lax
from jax.experimental import pallas as pl
from jax.experimental.pallas import tpu as pltpu


def _round_up(x, m):
    return (x + m - 1) // m * m


# ----------------------------- Pallas kernels -----------------------------

def _gate_kernel(x_ref, wg_ref, logits_ref):
    # x: (tm, H), wg: (E, H)  ->  logits: (tm, E) in f32  (nn.Linear, bias=False)
    logits_ref[...] = lax.dot_general(
        x_ref[...], wg_ref[...],
        dimension_numbers=(((1,), (1,)), ((), ())),
        preferred_element_type=jnp.float32,
    )


def _moe_kernel(cnt_ref, x_ref, w1_ref, w3_ref, w2_ref, wt_ref, out_ref, acc_ref):
    # Grid: (token tile t [parallel], expert e [arbitrary], I-tile i [arbitrary]).
    t = pl.program_id(0)
    e = pl.program_id(1)
    i = pl.program_id(2)
    n_e = pl.num_programs(1)
    n_i = pl.num_programs(2)

    @pl.when(jnp.logical_and(e == 0, i == 0))
    def _():
        acc_ref[...] = jnp.zeros_like(acc_ref)

    # Skip experts that received no tokens in this token tile (their routing
    # weights are all exactly zero, so their contribution would be zero anyway).
    @pl.when(cnt_ref[t, e] > 0)
    def _():
        x = x_ref[...]                 # (tm, H)   model dtype (bf16 for real models)
        w1 = w1_ref[0]                 # (ti, H)   gate-proj weight tile
        w3 = w3_ref[0]                 # (ti, H)   up-proj weight tile
        w2 = w2_ref[0]                 # (H, ti)   down-proj weight tile

        h1 = lax.dot_general(x, w1, dimension_numbers=(((1,), (1,)), ((), ())),
                             preferred_element_type=jnp.float32)   # (tm, ti) f32
        h3 = lax.dot_general(x, w3, dimension_numbers=(((1,), (1,)), ((), ())),
                             preferred_element_type=jnp.float32)   # (tm, ti) f32
        act = (h1 * jax.nn.sigmoid(h1)) * h3                        # SiLU(gate)*up, f32

        # Routing weight for (token, expert e): select column e from the lane-wide
        # (tm, E) block via iota compare + lane reduce (avoids width-1 blocks).
        sel = lax.broadcasted_iota(jnp.int32, wt_ref.shape, 1) == e
        wt = jnp.sum(jnp.where(sel, wt_ref[...], 0.0),
                     axis=1, keepdims=True)                         # (tm, 1) f32

        act = (act * wt).astype(w2.dtype)   # back to model dtype -> bf16 MXU down-proj
        acc_ref[...] += lax.dot_general(
            act, w2, dimension_numbers=(((1,), (1,)), ((), ())),
            preferred_element_type=jnp.float32)                     # (tm, H) f32

    @pl.when(jnp.logical_and(e == n_e - 1, i == n_i - 1))
    def _():
        out_ref[...] = acc_ref[...].astype(out_ref.dtype)


# ------------------------------ JAX wrapper --------------------------------

@functools.partial(jax.jit, static_argnames=("top_k", "tm", "ti"))
def mixtral_moe_forward(hidden_states, gate_w, w1, w3, w2, *, top_k,
                        tm=256, ti=512):
    orig_shape = hidden_states.shape
    H = orig_shape[-1]
    dtype = hidden_states.dtype
    x = hidden_states.reshape(-1, H)          # (T, H), kept in model dtype
    T = x.shape[0]
    E, I, _ = w1.shape

    # Tile sizes: clamp to full dims for small shapes, keep MXU-friendly multiples
    # otherwise; pad T so the token tile divides it.
    if T < tm:
        tm = _round_up(T, 8)
    Tp = _round_up(T, tm)
    if I % ti != 0:
        ti = I                                 # fall back to full-I tiles
    nt = Tp // tm
    ni = I // ti

    xp = jnp.pad(x, ((0, Tp - T), (0, 0)))

    # ---- router logits (Pallas matmul kernel, tiled over tokens) ----
    router_logits = pl.pallas_call(
        _gate_kernel,
        out_shape=jax.ShapeDtypeStruct((Tp, E), jnp.float32),
        grid=(nt,),
        in_specs=[
            pl.BlockSpec((tm, H), lambda t: (t, 0)),
            pl.BlockSpec((E, H), lambda t: (0, 0)),
        ],
        out_specs=pl.BlockSpec((tm, E), lambda t: (t, 0)),
        compiler_params=pltpu.CompilerParams(
            dimension_semantics=("parallel",)),
    )(xp, gate_w)

    # ---- top-k routing with renormalize=True (cheap glue, plain JAX, f32) ----
    probs = jax.nn.softmax(router_logits, axis=-1)
    topk_w, topk_idx = lax.top_k(probs, top_k)
    topk_w = topk_w / jnp.sum(topk_w, axis=-1, keepdims=True)
    dense_w = jnp.sum(jax.nn.one_hot(topk_idx, E, dtype=jnp.float32)
                      * topk_w[..., None], axis=1)                  # (Tp, E)
    valid = (jnp.arange(Tp) < T)[:, None]
    dense_w = jnp.where(valid, dense_w, 0.0)                        # zero pad rows
    # per-(token-tile, expert) routed-token counts -> scalar prefetch for the skip
    counts = (dense_w > 0).astype(jnp.int32).reshape(nt, tm, E).sum(axis=1)

    # ---- VMEM budget: double-buffered weight tiles + x/out tiles + f32 acc ----
    wbytes = jnp.dtype(dtype).itemsize
    est = 2 * 3 * ti * H * wbytes + tm * H * (2 * wbytes + 4) + tm * E * 4
    vmem_limit = int(min(max(2 * est, 32 * 1024 * 1024), 64 * 1024 * 1024))

    # ---- fused expert MLPs + weighted reduction (Pallas kernel) ----
    out = pl.pallas_call(
        _moe_kernel,
        out_shape=jax.ShapeDtypeStruct((Tp, H), dtype),
        grid_spec=pltpu.PrefetchScalarGridSpec(
            num_scalar_prefetch=1,
            grid=(nt, E, ni),
            in_specs=[
                pl.BlockSpec((tm, H), lambda t, e, i, cnt: (t, 0)),
                pl.BlockSpec((1, ti, H), lambda t, e, i, cnt: (e, i, 0)),
                pl.BlockSpec((1, ti, H), lambda t, e, i, cnt: (e, i, 0)),
                pl.BlockSpec((1, H, ti), lambda t, e, i, cnt: (e, 0, i)),
                pl.BlockSpec((tm, E), lambda t, e, i, cnt: (t, 0)),
            ],
            out_specs=pl.BlockSpec((tm, H), lambda t, e, i, cnt: (t, 0)),
            scratch_shapes=[pltpu.VMEM((tm, H), jnp.float32)],
        ),
        compiler_params=pltpu.CompilerParams(
            dimension_semantics=("parallel", "arbitrary", "arbitrary"),
            vmem_limit_bytes=vmem_limit),
    )(counts, xp, w1, w3, w2, dense_w)

    return out[:T].reshape(orig_shape)


# ----------------------------- pure-JAX reference ---------------------------

def _reference(hidden_states, gate_w, w1, w3, w2, top_k):
    orig_shape = hidden_states.shape
    H = orig_shape[-1]
    x = hidden_states.reshape(-1, H).astype(jnp.float32)
    logits = x @ gate_w.astype(jnp.float32).T
    probs = jax.nn.softmax(logits, axis=-1)
    topk_w, topk_idx = lax.top_k(probs, top_k)
    topk_w = topk_w / jnp.sum(topk_w, axis=-1, keepdims=True)
    T, E = probs.shape
    dense_w = jnp.sum(jax.nn.one_hot(topk_idx, E, dtype=jnp.float32)
                      * topk_w[..., None], axis=1)
    out = jnp.zeros_like(x)
    for e in range(E):
        w1e = w1[e].astype(jnp.float32)
        w3e = w3[e].astype(jnp.float32)
        w2e = w2[e].astype(jnp.float32)
        h1 = x @ w1e.T
        h3 = x @ w3e.T
        oe = ((h1 * jax.nn.sigmoid(h1)) * h3) @ w2e.T
        out = out + dense_w[:, e:e + 1] * oe
    return out.reshape(orig_shape)


# ---------------------------------- main ------------------------------------

if __name__ == "__main__":
    # Small synthetic config: hidden=32, intermediate=64, 8 experts, top_k=2
    batch, seq = 2, 8
    hidden_size = 32
    intermediate_size = 64
    num_local_experts = 8
    num_experts_per_tok = 2

    key = jax.random.PRNGKey(0)
    k_x, k_g, k_w1, k_w3, k_w2 = jax.random.split(key, 5)

    hidden_states = jax.random.normal(k_x, (batch, seq, hidden_size), jnp.float32)
    gate_w = 0.05 * jax.random.normal(k_g, (num_local_experts, hidden_size), jnp.float32)
    w1 = 0.05 * jax.random.normal(k_w1, (num_local_experts, intermediate_size, hidden_size), jnp.float32)
    w3 = 0.05 * jax.random.normal(k_w3, (num_local_experts, intermediate_size, hidden_size), jnp.float32)
    w2 = 0.05 * jax.random.normal(k_w2, (num_local_experts, hidden_size, intermediate_size), jnp.float32)

    # f32 path: tight correctness check against the pure-JAX reference.
    out_f32 = mixtral_moe_forward(hidden_states, gate_w, w1, w3, w2,
                                  top_k=num_experts_per_tok)
    out_f32 = jax.block_until_ready(out_f32)
    ref_f32 = _reference(hidden_states, gate_w, w1, w3, w2, num_experts_per_tok)
    assert out_f32.shape == hidden_states.shape
    assert jnp.allclose(out_f32, ref_f32, atol=1e-4, rtol=1e-4), "f32 mismatch vs reference"

    # bf16 path (deployment dtype: bf16 MXU inputs, f32 accumulation, bf16 output).
    hs_bf16 = hidden_states.astype(jnp.bfloat16)
    out_bf16 = mixtral_moe_forward(hs_bf16, gate_w.astype(jnp.bfloat16),
                                   w1.astype(jnp.bfloat16), w3.astype(jnp.bfloat16),
                                   w2.astype(jnp.bfloat16), top_k=num_experts_per_tok)
    out_bf16 = jax.block_until_ready(out_bf16)
    ref_bf16 = _reference(hs_bf16, gate_w.astype(jnp.bfloat16),
                          w1.astype(jnp.bfloat16), w3.astype(jnp.bfloat16),
                          w2.astype(jnp.bfloat16), num_experts_per_tok)
    assert out_bf16.dtype == jnp.bfloat16
    assert jnp.allclose(out_bf16.astype(jnp.float32), ref_bf16,
                        atol=1e-2, rtol=1e-1), "bf16 mismatch vs reference"

    print("KERNEL_OK")
</pallas_src>

<mosaic_0001>
module attributes {stable_mosaic.version = 11 : i64} {
  func.func @_gate_kernel(%arg0: i32, %arg1: memref<16x32xf32, #tpu.memory_space<vmem>>, %arg2: memref<8x32xf32, #tpu.memory_space<vmem>>, %arg3: memref<16x8xf32, #tpu.memory_space<vmem>>) attributes {dimension_semantics = [#tpu.dimension_semantics<parallel>], iteration_bounds = array<i64: 1>, scalar_prefetch = 0 : i64, scratch_operands = 0 : i64, tpu.core_type = #tpu.core_type<tc>, window_params = [{transform_indices = @transform_0, window_bounds = array<i64: 16, 32>}, {pipeline_mode = #tpu.pipeline_mode<synchronous>, transform_indices = @transform_1, window_bounds = array<i64: 8, 32>}, {transform_indices = @transform_2, window_bounds = array<i64: 16, 8>}]} {
    %c0 = arith.constant 0 : index
    %c0_0 = arith.constant 0 : index
    %0 = vector.load %arg1[%c0, %c0_0] : memref<16x32xf32, #tpu.memory_space<vmem>>, vector<16x32xf32>
    %c0_1 = arith.constant 0 : index
    %c0_2 = arith.constant 0 : index
    %1 = vector.load %arg2[%c0_1, %c0_2] : memref<8x32xf32, #tpu.memory_space<vmem>>, vector<8x32xf32>
    %cst = arith.constant dense<0.000000e+00> : vector<16x8xf32>
    %2 = tpu.matmul %0, %1, %cst {dimension_numbers = #tpu.dot_dimension_numbers<[1], [1], [0], [0], [0, 0, 1, 0], [], []>} : vector<16x32xf32>, vector<8x32xf32>, vector<16x8xf32> -> vector<16x8xf32>
    %c0_3 = arith.constant 0 : index
    %c0_4 = arith.constant 0 : index
    %3 = vector.load %arg3[%c0_3, %c0_4] : memref<16x8xf32, #tpu.memory_space<vmem>>, vector<16x8xf32>
    tpu.vector_store %arg3[%c0_3, %c0_4], %2 {strides = array<i32>} : memref<16x8xf32, #tpu.memory_space<vmem>>, vector<16x8xf32>,
    return
  }
  func.func @transform_0(%arg0: i32) -> (i32, i32) {
    %c0_i32 = arith.constant 0 : i32
    %c0_i32_0 = arith.constant 0 : i32
    return %arg0, %c0_i32 : i32, i32
  }
  func.func @transform_1(%arg0: i32) -> (i32, i32) {
    %c0_i32 = arith.constant 0 : i32
    %c0_i32_0 = arith.constant 0 : i32
    %c0_i32_1 = arith.constant 0 : i32
    return %c0_i32, %c0_i32_0 : i32, i32
  }
  func.func @transform_2(%arg0: i32) -> (i32, i32) {
    %c0_i32 = arith.constant 0 : i32
    %c0_i32_0 = arith.constant 0 : i32
    return %arg0, %c0_i32 : i32, i32
  }
}

module attributes {stable_mosaic.version = 11 : i64} {
  func.func @_moe_kernel(%arg0: i32, %arg1: i32, %arg2: i32, %arg3: memref<1x8xi32, #tpu.memory_space<smem>>, %arg4: memref<16x32xf32, #tpu.memory_space<vmem>>, %arg5: memref<1x64x32xf32, #tpu.memory_space<vmem>>, %arg6: memref<1x64x32xf32, #tpu.memory_space<vmem>>, %arg7: memref<1x32x64xf32, #tpu.memory_space<vmem>>, %arg8: memref<16x8xf32, #tpu.memory_space<vmem>>, %arg9: memref<16x32xf32, #tpu.memory_space<vmem>>, %arg10: memref<16x32xf32, #tpu.memory_space<vmem>>) attributes {dimension_semantics = [#tpu.dimension_semantics<parallel>, #tpu.dimension_semantics<arbitrary>, #tpu.dimension_semantics<arbitrary>], iteration_bounds = array<i64: 1, 8, 1>, scalar_prefetch = 1 : i64, scratch_operands = 1 : i64, tpu.core_type = #tpu.core_type<tc>, window_params = [{transform_indices = @transform_0, window_bounds = array<i64: 16, 32>}, {transform_indices = @transform_1, window_bounds = array<i64: 1, 64, 32>}, {transform_indices = @transform_2, window_bounds = array<i64: 1, 64, 32>}, {transform_indices = @transform_3, window_bounds = array<i64: 1, 32, 64>}, {transform_indices = @transform_4, window_bounds = array<i64: 16, 8>}, {transform_indices = @transform_5, window_bounds = array<i64: 16, 32>}]} {
    %c0_i32 = arith.constant 0 : i32
    %0 = arith.cmpi eq, %arg1, %c0_i32 : i32
    %c0_i32_0 = arith.constant 0 : i32
    %1 = arith.cmpi eq, %arg2, %c0_i32_0 : i32
    %2 = arith.andi %0, %1 : i1
    %3 = arith.extui %2 : i1 to i32
    %c0_i32_1 = arith.constant 0 : i32
    %4 = arith.cmpi ne, %3, %c0_i32_1 : i32
    scf.if %4 {
      %cst = arith.constant 0.000000e+00 : f32
      %16 = vector.broadcast %cst : f32 to vector<16x32xf32>
      %c0 = arith.constant 0 : index
      %c0_6 = arith.constant 0 : index
      %17 = vector.load %arg10[%c0, %c0_6] : memref<16x32xf32, #tpu.memory_space<vmem>>, vector<16x32xf32>
      tpu.vector_store %arg10[%c0, %c0_6], %16 {strides = array<i32>} : memref<16x32xf32, #tpu.memory_space<vmem>>, vector<16x32xf32>,
    } else {
    }
    %5 = arith.index_cast %arg0 : i32 to index
    %6 = arith.index_cast %arg1 : i32 to index
    %7 = memref.load %arg3[%5, %6] : memref<1x8xi32, #tpu.memory_space<smem>>
    %c0_i32_2 = arith.constant 0 : i32
    %8 = arith.cmpi sgt, %7, %c0_i32_2 : i32
    %9 = arith.extui %8 : i1 to i32
    %c0_i32_3 = arith.constant 0 : i32
    %10 = arith.cmpi ne, %9, %c0_i32_3 : i32
    scf.if %10 {
      %c0 = arith.constant 0 : index
      %c0_6 = arith.constant 0 : index
      %16 = vector.load %arg4[%c0, %c0_6] : memref<16x32xf32, #tpu.memory_space<vmem>>, vector<16x32xf32>
      %c0_7 = arith.constant 0 : index
      %c0_8 = arith.constant 0 : index
      %c0_9 = arith.constant 0 : index
      %17 = vector.load %arg5[%c0_7, %c0_8, %c0_9] : memref<1x64x32xf32, #tpu.memory_space<vmem>>, vector<1x64x32xf32>
      %18 = vector.shape_cast %17 : vector<1x64x32xf32> to vector<64x32xf32>
      %c0_10 = arith.constant 0 : index
      %c0_11 = arith.constant 0 : index
      %c0_12 = arith.constant 0 : index
      %19 = vector.load %arg6[%c0_10, %c0_11, %c0_12] : memref<1x64x32xf32, #tpu.memory_space<vmem>>, vector<1x64x32xf32>
      %20 = vector.shape_cast %19 : vector<1x64x32xf32> to vector<64x32xf32>
      %c0_13 = arith.constant 0 : index
      %c0_14 = arith.constant 0 : index
      %c0_15 = arith.constant 0 : index
      %21 = vector.load %arg7[%c0_13, %c0_14, %c0_15] : memref<1x32x64xf32, #tpu.memory_space<vmem>>, vector<1x32x64xf32>
      %22 = vector.shape_cast %21 : vector<1x32x64xf32> to vector<32x64xf32>
      %cst = arith.constant dense<0.000000e+00> : vector<16x64xf32>
      %23 = tpu.matmul %16, %18, %cst {dimension_numbers = #tpu.dot_dimension_numbers<[1], [1], [0], [0], [0, 0, 1, 0], [], []>} : vector<16x32xf32>, vector<64x32xf32>, vector<16x64xf32> -> vector<16x64xf32>
      %cst_16 = arith.constant dense<0.000000e+00> : vector<16x64xf32>
      %24 = tpu.matmul %16, %20, %cst_16 {dimension_numbers = #tpu.dot_dimension_numbers<[1], [1], [0], [0], [0, 0, 1, 0], [], []>} : vector<16x32xf32>, vector<64x32xf32>, vector<16x64xf32> -> vector<16x64xf32>
      %25 = arith.negf %23 : vector<16x64xf32>
      %26 = math.exp %25 : vector<16x64xf32>
      %cst_17 = arith.constant 1.000000e+00 : f32
      %27 = vector.broadcast %cst_17 : f32 to vector<16x64xf32>
      %28 = arith.addf %27, %26 : vector<16x64xf32>
      %29 = arith.divf %27, %28 : vector<16x64xf32>
      %30 = arith.mulf %23, %29 : vector<16x64xf32>
      %31 = arith.mulf %30, %24 : vector<16x64xf32>
      %32 = tpu.iota {dimensions = array<i32: 1>} : vector<16x8xi32>
      %33 = vector.broadcast %arg1 : i32 to vector<16x8xi32>
      %34 = arith.cmpi eq, %32, %33 : vector<16x8xi32>
      %c0_18 = arith.constant 0 : index
      %c0_19 = arith.constant 0 : index
      %35 = vector.load %arg8[%c0_18, %c0_19] : memref<16x8xf32, #tpu.memory_space<vmem>>, vector<16x8xf32>
      %cst_20 = arith.constant 0.000000e+00 : f32
      %36 = vector.broadcast %cst_20 : f32 to vector<16x8xf32>
      %37 = arith.select %34, %35, %36 : vector<16x8xi1>, vector<16x8xf32>
      %cst_21 = arith.constant dense<0.000000e+00> : vector<16xf32>
      %38 = vector.multi_reduction <add>, %37, %cst_21 [1] : vector<16x8xf32> to vector<16xf32>
      %39 = vector.shape_cast %38 : vector<16xf32> to vector<16x1xf32>
      %40 = vector.broadcast %39 : vector<16x1xf32> to vector<16x64xf32>
      %41 = arith.mulf %31, %40 : vector<16x64xf32>
      %c0_22 = arith.constant 0 : index
      %c0_23 = arith.constant 0 : index
      %42 = vector.load %arg10[%c0_22, %c0_23] : memref<16x32xf32, #tpu.memory_space<vmem>>, vector<16x32xf32>
      %cst_24 = arith.constant dense<0.000000e+00> : vector<16x32xf32>
      %43 = tpu.matmul %41, %22, %cst_24 {dimension_numbers = #tpu.dot_dimension_numbers<[1], [1], [0], [0], [0, 0, 1, 0], [], []>} : vector<16x64xf32>, vector<32x64xf32>, vector<16x32xf32> -> vector<16x32xf32>
      %44 = arith.addf %42, %43 : vector<16x32xf32>
      %c0_25 = arith.constant 0 : index
      %c0_26 = arith.constant 0 : index
      %45 = vector.load %arg10[%c0_25, %c0_26] : memref<16x32xf32, #tpu.memory_space<vmem>>, vector<16x32xf32>
      tpu.vector_store %arg10[%c0_25, %c0_26], %44 {strides = array<i32>} : memref<16x32xf32, #tpu.memory_space<vmem>>, vector<16x32xf32>,
    } else {
    }
    %c7_i32 = arith.constant 7 : i32
    %11 = arith.cmpi eq, %arg1, %c7_i32 : i32
    %c0_i32_4 = arith.constant 0 : i32
    %12 = arith.cmpi eq, %arg2, %c0_i32_4 : i32
    %13 = arith.andi %11, %12 : i1
    %14 = arith.extui %13 : i1 to i32
    %c0_i32_5 = arith.constant 0 : i32
    %15 = arith.cmpi ne, %14, %c0_i32_5 : i32
    scf.if %15 {
      %c0 = arith.constant 0 : index
      %c0_6 = arith.constant 0 : index
      %16 = vector.load %arg10[%c0, %c0_6] : memref<16x32xf32, #tpu.memory_space<vmem>>, vector<16x32xf32>
      %c0_7 = arith.constant 0 : index
      %c0_8 = arith.constant 0 : index
      %17 = vector.load %arg9[%c0_7, %c0_8] : memref<16x32xf32, #tpu.memory_space<vmem>>, vector<16x32xf32>
      tpu.vector_store %arg9[%c0_7, %c0_8], %16 {strides = array<i32>} : memref<16x32xf32, #tpu.memory_space<vmem>>, vector<16x32xf32>,
    } else {
    }
    return
  }
  func.func @transform_0(%arg0: i32, %arg1: i32, %arg2: i32, %arg3: memref<1x8xi32, #tpu.memory_space<smem>>) -> (i32, i32) {
    %c0_i32 = arith.constant 0 : i32
    %c0_i32_0 = arith.constant 0 : i32
    return %arg0, %c0_i32 : i32, i32
  }
  func.func @transform_1(%arg0: i32, %arg1: i32, %arg2: i32, %arg3: memref<1x8xi32, #tpu.memory_space<smem>>) -> (i32, i32, i32) {
    %c0_i32 = arith.constant 0 : i32
    %c0_i32_0 = arith.constant 0 : i32
    return %arg1, %arg2, %c0_i32 : i32, i32, i32
  }
  func.func @transform_2(%arg0: i32, %arg1: i32, %arg2: i32, %arg3: memref<1x8xi32, #tpu.memory_space<smem>>) -> (i32, i32, i32) {
    %c0_i32 = arith.constant 0 : i32
    %c0_i32_0 = arith.constant 0 : i32
    return %arg1, %arg2, %c0_i32 : i32, i32, i32
  }
  func.func @transform_3(%arg0: i32, %arg1: i32, %arg2: i32, %arg3: memref<1x8xi32, #tpu.memory_space<smem>>) -> (i32, i32, i32) {
    %c0_i32 = arith.constant 0 : i32
    %c0_i32_0 = arith.constant 0 : i32
    return %arg1, %c0_i32, %arg2 : i32, i32, i32
  }
  func.func @transform_4(%arg0: i32, %arg1: i32, %arg2: i32, %arg3: memref<1x8xi32, #tpu.memory_space<smem>>) -> (i32, i32) {
    %c0_i32 = arith.constant 0 : i32
    %c0_i32_0 = arith.constant 0 : i32
    return %arg0, %c0_i32 : i32, i32
  }
  func.func @transform_5(%arg0: i32, %arg1: i32, %arg2: i32, %arg3: memref<1x8xi32, #tpu.memory_space<smem>>) -> (i32, i32) {
    %c0_i32 = arith.constant 0 : i32
    %c0_i32_0 = arith.constant 0 : i32
    return %arg0, %c0_i32 : i32, i32
  }
}

</mosaic_0001>

<bundles_post_ra>
// kernel: mixtral_moe_forward.2
= control target key start
LH: loop header
LB: loop body
LE: loop exit
PB: predicated region body
PF: predicated region fallthrough
CT: control target
= control target key end

     0   :  { %7 = vsyncpa [#allocation3], 0  ;;  %s246_s0 = inlined_call_operand.hbm [shape: f32[16,32], index: 0, kind: input, shape index: {}]   ;;  %s247_s1 = inlined_call_operand.hbm [shape: f32[8,32], index: 1, kind: input, shape index: {}]   ;;  %s248_s2 = inlined_call_operand.vmem [shape: f32[16,8], index: 2, kind: output, shape index: {}]  }
   0x1   :  { %8 = vsyncpa [#allocation5], 0  ;;  %s197_s9 = smov [#allocation2]   ;;  %s149_s13 = scalar_lea.hbm %s246_s0, 256 }
   0x2   :  { %s14_s10 = sshll.u32 %s197_s9, 4  ;;  %p150_p0 = scmp.ne.s32.totalorder %s246_s0, %s149_s13  ;;  %s15_s10 = int_to_ptr.vmem [resolvable:$true] %s14_s10 }
   0x3   :  { %p153_p1 = scmp.lt.u32.totalorder %s149_s13, %s246_s0 }
   0x5   :  { %p155_p2 = pnand %p153_p1, %p150_p0 }
   0x7   :  { %158 = shalt.err (!%p155_p2)
}
   0x8   :  { %s159_s18 = scalar_lea.vmem %s15_s10, 256  ;;  %p164_p4 = scmp.lt.s32.totalorder %s15_s10, %s15_s10 }
   0x9   :  { %p160_p3 = scmp.ne.s32.totalorder %s15_s10, %s159_s18  ;;  %p165_p5 = scmp.lt.s32.totalorder %s159_s18, %s159_s18 }
   0xb   :  { %p166_p6 = por %p165_p5, %p164_p4 }
   0xd   :  { %p167_p7 = pnand %p166_p6, %p160_p3 }
   0xf   :  { %170 = shalt.err (!%p167_p7)
}
  0x10   :  { %s198_s19 = smov 128   ;;  %s199_s20 = smov 8  }
  0x11   :  { %20 = dma.hbm_to_vmem [thread:$0]  %s246_s0, 256, %s15_s10, [#allocation3], %s198_s19, %s198_s19, %s199_s20  }
  0x12   :  { %s200_s23 = smov [#allocation4]   ;;  %s171_s27 = scalar_lea.hbm %s247_s1, 128 }
  0x13   :  { %s27_s24 = sshll.u32 %s200_s23, 4  ;;  %p172_p8 = scmp.ne.s32.totalorder %s247_s1, %s171_s27  ;;  %s28_s24 = int_to_ptr.vmem [resolvable:$true] %s27_s24 }
  0x14   :  { %p175_p9 = scmp.lt.u32.totalorder %s171_s27, %s247_s1 }
  0x16   :  { %p177_p10 = pnand %p175_p9, %p172_p8 }
  0x18   :  { %180 = shalt.err (!%p177_p10)
}
  0x19   :  { %s181_s4 = scalar_lea.vmem %s28_s24, 128  ;;  %p186_p12 = scmp.lt.s32.totalorder %s28_s24, %s28_s24 }
  0x1a   :  { %p182_p11 = scmp.ne.s32.totalorder %s28_s24, %s181_s4  ;;  %p187_p13 = scmp.lt.s32.totalorder %s181_s4, %s181_s4 }
  0x1c   :  { %p188_p0 = por %p187_p13, %p186_p12 }
  0x1e   :  { %p189_p1 = pnand %p188_p0, %p182_p11 }
  0x20   :  { %192 = shalt.err (!%p189_p1)
}
  0x21   :  { %30 = dma.hbm_to_vmem [thread:$0]  %s247_s1, 128, %s28_s24, [#allocation5]  }
  0x22   :  { %193 = dma.done.wait [#allocation3], 256  }
  0x23   :  { %194 = vsyncadd [#allocation3], 4294967040 }
  0x24   :  { %195 = dma.done.wait [#allocation5], 128  }
  0x25   :  { %196 = vsyncadd [#allocation5], 4294967168  ;;  %vm40_vm0 = vcmask 261120   ;;  %v39_v0 = vld [vmem:[#allocation4] sm:$0xff]  ;;  %v37_v1 = vld [vmem:[#allocation2] sm:$0xff]  ;;  %vm125_vm1 = vcmask 64512  }
  0x26   :  { %140 = vmatprep.subr.msk.mxu0 %vm40_vm0, %v39_v0  ;;  %142 = vmatprep.mubr.msk.f32.mxu0 %vm40_vm0, %v37_v1  ;;  %v38_v2 = vld [vmem:[#allocation2 + $0x8] sm:$0xff] }
  0x27   :  { %141 = vmatpush3.xpose.msk.msra.mxu0 %vm40_vm0, %v39_v0 }
  0x2a   :  { %143 = vmatmul.mubr.msk.f32.vlgmr.msra.gmra.mrb[0].mxu0 %vm40_vm0, %v38_v2 }
  0xfd   :  { %v144_v3 = vpop.f32.mrb[0].mxu0 }
  0xfe   :  { %127 = vst.msk [vmem:[%s248_s2 + $0x8] sm:$0xff] %vm125_vm1, %v144_v3  ;;  %v116_v4 = vpop.f32.mrb[1].mxu0 }
  0xff   :  { %126 = vst.msk [vmem:[%s248_s2] sm:$0xff] %vm125_vm1, %v116_v4 }
 0x100   :  { %132 = vsyncpa [#allocation3], 1 }
 0x101   :  { %133 = vsyncpa [#allocation5], 1 }

// kernel: mixtral_moe_forward.3
= control target key start
LH: loop header
LB: loop body
LE: loop exit
PB: predicated region body
PF: predicated region fallthrough
CT: control target
= control target key end

     0   :  { %s1408_s0 = inlined_call_operand.vmem [shape: s32[1,8], index: 0, kind: input, shape index: {}]   ;;  %s1409_s1 = inlined_call_operand.vmem [shape: f32[16,32], index: 1, kind: input, shape index: {}]   ;;  %s1410_s2 = inlined_call_operand.vmem [shape: f32[8,64,32], index: 2, kind: input, shape index: {}]   ;;  %s1411_s3 = inlined_call_operand.vmem [shape: f32[8,64,32], index: 3, kind: input, shape index: {}]   ;;  %s1412_s4 = inlined_call_operand.vmem [shape: f32[8,32,64], index: 4, kind: input, shape index: {}]   ;;  %s1413_s5 = inlined_call_operand.vmem [shape: f32[16,8], index: 5, kind: input, shape index: {}]   ;;  %s1414_s6 = inlined_call_operand.hbm [shape: f32[16,32], index: 6, kind: output, shape index: {}]  }
   0x1   :  { %s11_s23 = sshll.u32 %s1408_s0, 4  ;;  %s12_s23 = int_to_ptr.vmem [resolvable:$true] %s11_s23 }
   0x2   :  { %s1129_s24 = scalar_lea.vmem %s12_s23, 16  ;;  %p1134_p1 = scmp.lt.s32.totalorder %s12_s23, %s12_s23 }
   0x3   :  { %p1130_p0 = scmp.ne.s32.totalorder %s12_s23, %s1129_s24  ;;  %p1135_p2 = scmp.lt.s32.totalorder %s1129_s24, %s1129_s24 }
   0x5   :  { %p1136_p3 = por %p1135_p2, %p1134_p1 }
   0x7   :  { %p1137_p4 = pnand %p1136_p3, %p1130_p0 }
   0x9   :  { %1140 = shalt.err (!%p1137_p4)  }
   0xa   :  { %s1197_s25 = smov [#allocation4]  }
   0xb   :  { %14 = dma.vmem_to_smem %s12_s23, 16, %s1197_s25, [#allocation3] }
   0xc   :  { %1179 = dma.done.wait [#allocation3], 16 }
   0xd   :  { %1180 = vsyncadd [#allocation3], 4294967280 }
   0xe   :  { %16 = sfence }
   0xf   :  { %17 = vsyncpa [#allocation6], 0  ;;  %s1240_s26 = smov 0   ;;  %s1242_s27 = smov 0  }
  0x10   :  { %s1244_s28 = smov 0  }
  0x11 LB: > { %s898_s0 = sadd.s32 4294967295, %s1195_s28   ;;  %s38_s29 = sadd.s32 1, %s1191_s27  ;;  %s1195_s28 = sphi %s1244_s28, %s23_s28   ;;  %s1191_s27 = sphi %s1242_s27, %s1421_s27   ;;  %s1187_s26 = sphi %s1240_s26, %s1420_s26  }
  0x12   : > { %p40_p5 = scmp.ge.s32.totalorder %s38_s29, 8  ;;  %p903_p6 = scmp.ge.s32.totalorder %s1195_s28, 1 }
  0x13   : > { %p275_p7 = scmp.lt.s32.totalorder %s1195_s28, 9 }
  0x14   : > { %s1423_s29 = smov (%p40_p5, %s38_s29), 0 }
  0x15   : > { %p276_p8 = pnand %p903_p6, %p275_p7 }
  0x16   : > { %p336_p9 = scmp.lt.s32.totalorder (!%p276_p8), %s1187_s26, 7  ;;  %p370_p10 = scmp.eq.s32.totalorder (!%p276_p8), %s1187_s26, 0 }
  0x17   : > { %279 = sbr.rel (%p276_p8) target bundleno = 580 (0x244), region = 40 }
  0x1e   : > { %s337_s30 = scalar_select %p336_p9, %s1187_s26, 7 }
  0x1f   : > { %375 = sbr.rel (!%p370_p10) target bundleno = 38 (0x26), region = 44  ;;  %vm376_vm0 = vcmask (%p370_p10), 261120   ;;  %v1198_v0 = vmov (%p370_p10), 0.0  }
  0x20   : > { %s946_s7 = sshll.u32 %s337_s30, 6  ;;  %s948_s8 = sshll.u32 %s337_s30, 5  ;;  %377 = vst.msk [vmem:[#allocation2] sm:$0xff] (%p370_p10), %vm376_vm0, %v1198_v0  ;;  %378 = vst.msk [vmem:[#allocation2 + $0x8] sm:$0xff] (%p370_p10), %vm376_vm0, %v1198_v0 }
  0x21   : > { %s1267_s11 = scalar_lea.vmem %s1410_s2, %s946_s7  ;;  %s1272_s14 = scalar_lea.vmem %s1411_s3, %s946_s7 }
  0x22   : > { %s1277_s17 = scalar_lea.vmem %s1412_s4, %s948_s8 }
  0x26 PF: > { %s379_s18 = sshra.s32 %s1187_s26, 7  ;;  %s384_s19 = sand.u32 127, %s1187_s26 }
  0x27   : > { %s911_s20 = sshll.u32 %s379_s18, 7 }
  0x28   : > { %s385_s21 = sadd.s32 %s911_s20, %s384_s19 }
  0x29   : > { %s386_s22 = sld [smem:[#allocation4 + %s385_s21]] }
  0x2f   : > { %p912_p11 = scmp.le.s32.totalorder %s386_s22, 0 }
  0x30   : > { %v393_v1 = vld [vmem:[%s1267_s11] sm:$0xff] (!%p912_p11)  ;;  %v394_v2 = vld [vmem:[%s1267_s11 + $0x8] sm:$0xff] (!%p912_p11)  ;;  %vm413_vm1 = vcmask (!%p912_p11), 261120   ;;  %v395_v3 = vld [vmem:[%s1267_s11 + $0x10] sm:$0xff] (!%p912_p11)  ;;  %v634_v4 = vlaneseq (!%p912_p11)  ;;  %v636_v8 = vstv (!%p912_p11), %s1187_s26  ;;  %vm642_vm4 = vcmask (!%p912_p11), 64512  }
  0x31   : > { %390 = sbr.rel (%p912_p11) target bundleno = 545 (0x221), region = 48  ;;  %v1026_v5 = vpack.c.bf16 (!%p912_p11), %v394_v2, %v393_v1  ;;  %vm1286_vm2 = vmpackc.low (!%p912_p11), %vm413_vm1, %vm413_vm1  ;;  %v396_v7 = vld [vmem:[%s1267_s11 + $0x18] sm:$0xff] (!%p912_p11)  ;;  %v401_v11 = vld [vmem:[%s1272_s14] sm:$0xff] (!%p912_p11)  ;;  %vm653_vm5 = vcmask (!%p912_p11), 523264  }
  0x32   : > { %v1032_v9 = vpack.c.bf16 (!%p912_p11), %v396_v7, %v395_v3  ;;  %v635_v10 = vand.u32 (!%p912_p11), 127, %v634_v4  ;;  %v402_v12 = vld [vmem:[%s1272_s14 + $0x8] sm:$0xff] (!%p912_p11)  ;;  %v391_v13 = vld [vmem:[%s1409_s1] sm:$0xff] (!%p912_p11)  ;;  %v403_v15 = vld [vmem:[%s1272_s14 + $0x10] sm:$0xff] (!%p912_p11) }
  0x33   : > { %1028 = vmatprep.subr.msk.bf16.mxu0 (!%p912_p11), %vm1286_vm2, %v1026_v5  ;;  %v1050_v14 = vpack.c.bf16 (!%p912_p11), %v402_v12, %v401_v11  ;;  %993 = vmatprep.mubr.msk.f32.mxu0 (!%p912_p11), %vm413_vm1, %v391_v13  ;;  %v404_v16 = vld [vmem:[%s1272_s14 + $0x18] sm:$0xff] (!%p912_p11)  ;;  %v397_v18 = vld [vmem:[%s1267_s11 + $0x20] sm:$0xff] (!%p912_p11)  ;;  %v398_v20 = vld [vmem:[%s1267_s11 + $0x28] sm:$0xff] (!%p912_p11) }
  0x34   : > { %1031 = vmatpush3.bf16.xpose.msk.msra.mxu0 (!%p912_p11), %vm1286_vm2, %v1026_v5  ;;  %vm1304_vm3 = vcmp.eq.s32.totalorder (!%p912_p11), %v635_v10, %v636_v8  ;;  %v1056_v19 = vpack.c.bf16 (!%p912_p11), %v404_v16, %v403_v15  ;;  %1012 = vmatprep.mubr.msk.f32.mxu1 (!%p912_p11), %vm413_vm1, %v391_v13  ;;  %v638_v21 = vld [vmem:[%s1413_s5] sm:$0xff] (!%p912_p11)  ;;  %v639_v22 = vld [vmem:[%s1413_s5 + $0x8] sm:$0xff] (!%p912_p11)  ;;  %v1038_v26 = vpack.c.bf16 (!%p912_p11), %v398_v20, %v397_v18  ;;  %v399_v31 = vld [vmem:[%s1267_s11 + $0x30] sm:$0xff] (!%p912_p11) }
  0x35   : > { %1034 = vmatprep.subr.msk.bf16.mxu0 (!%p912_p11), %vm1286_vm2, %v1032_v9  ;;  %1052 = vmatprep.subr.msk.bf16.mxu1 (!%p912_p11), %vm1286_vm2, %v1050_v14  ;;  %v640_v23 = vsel (!%p912_p11), %vm1304_vm3, %v638_v21, 0.0  ;;  %v641_v24 = vsel (!%p912_p11), %vm1304_vm3, %v639_v22, 0.0  ;;  %v405_v27 = vld [vmem:[%s1272_s14 + $0x20] sm:$0xff] (!%p912_p11)  ;;  %v406_v28 = vld [vmem:[%s1272_s14 + $0x28] sm:$0xff] (!%p912_p11)  ;;  %v400_v32 = vld [vmem:[%s1267_s11 + $0x38] sm:$0xff] (!%p912_p11) }
  0x36   : > { %1055 = vmatpush3.bf16.xpose.msk.msra.mxu1 (!%p912_p11), %vm1286_vm2, %v1050_v14  ;;  %v643_v25 = vsel (!%p912_p11), %vm642_vm4, %v640_v23, 0.0  ;;  %v646_v29 = vsel (!%p912_p11), %vm642_vm4, %v641_v24, 0.0  ;;  %v1062_v30 = vpack.c.bf16 (!%p912_p11), %v406_v28, %v405_v27  ;;  %v1044_v33 = vpack.c.bf16 (!%p912_p11), %v400_v32, %v399_v31  ;;  %v407_v34 = vld [vmem:[%s1272_s14 + $0x30] sm:$0xff] (!%p912_p11)  ;;  %v408_v35 = vld [vmem:[%s1272_s14 + $0x38] sm:$0xff] (!%p912_p11)  ;;  %v392_v37 = vld [vmem:[%s1409_s1 + $0x8] sm:$0xff] (!%p912_p11) }
  0x37   : > { %1058 = vmatprep.subr.msk.bf16.mxu1 (!%p912_p11), %vm1286_vm2, %v1056_v19  ;;  %644 = vadd.xlane.f32.xlu0 (!%p912_p11), %v643_v25  ;;  %v1068_v36 = vpack.c.bf16 (!%p912_p11), %v408_v35, %v407_v34  ;;  %v409_v38 = vld [vmem:[%s1277_s17] sm:$0xff] (!%p912_p11)  ;;  %v410_v39 = vld [vmem:[%s1277_s17 + $0x8] sm:$0xff] (!%p912_p11)  ;;  %vm1075_vm6 = vmpackc.low (!%p912_p11), %vm653_vm5, %vm653_vm5 }
  0x38   : > { %v1074_v40 = vpack.c.bf16 %v410_v39, %v409_v38  ;;  %v411_v41 = vld [vmem:[%s1277_s17 + $0x10] sm:$0xff]  ;;  %v412_v42 = vld [vmem:[%s1277_s17 + $0x18] sm:$0xff]  ;;  %v652_v0 = vld [vmem:[#allocation2 + $0x8] sm:$0xff] }
  0x39   : > { %v1080_v43 = vpack.c.bf16 %v412_v42, %v411_v41  ;;  %v651_v1 = vld [vmem:[#allocation2] sm:$0xff] }
  0x3b   : > { %647 = vadd.xlane.f32.xlu0 %v646_v29 }
  0x3c   : > { %1037 = vmatpush3.bf16.xpose.msk.msra.mxu0 %vm1286_vm2, %v1032_v9 }
  0x3d   : > { %1040 = vmatprep.subr.msk.bf16.mxu0 %vm1286_vm2, %v1038_v26 }
  0x3e   : > { %1061 = vmatpush3.bf16.xpose.msk.msra.mxu1 %vm1286_vm2, %v1056_v19 }
  0x3f   : > { %1064 = vmatprep.subr.msk.bf16.mxu1 %vm1286_vm2, %v1062_v30 }
  0x44   : > { %1043 = vmatpush3.bf16.xpose.msk.msra.mxu0 %vm1286_vm2, %v1038_v26 }
  0x45   : > { %1046 = vmatprep.subr.msk.bf16.mxu0 %vm1286_vm2, %v1044_v33 }
  0x46   : > { %1067 = vmatpush3.bf16.xpose.msk.msra.mxu1 %vm1286_vm2, %v1062_v30 }
  0x47   : > { %1070 = vmatprep.subr.msk.bf16.mxu1 %vm1286_vm2, %v1068_v36 }
  0x4c   : > { %1049 = vmatpush3.bf16.xpose.msk.msra.mxu0 %vm1286_vm2, %v1044_v33 }
  0x4d   : > { %1076 = vmatprep.subr.msk.bf16.mxu0 %vm1075_vm6, %v1074_v40 }
  0x4e   : > { %1073 = vmatpush3.bf16.xpose.msk.msra.mxu1 %vm1286_vm2, %v1068_v36 }
  0x53   : > { %994 = vmatmul.mubr.msk.f32.vlgmr.msra.gmra.mrb[0].mxu0 %vm413_vm1, %v392_v37 }
  0x54   : > { %1079 = vmatpush3.bf16.xpose.msk.msra.mxu0 %vm1075_vm6, %v1074_v40 }
  0x55   : > { %1013 = vmatmul.mubr.msk.f32.vlgmr.msra.gmra.mrb[0].mxu1 %vm413_vm1, %v392_v37  ;;  %1082 = vmatprep.subr.msk.bf16.mxu0 %vm1075_vm6, %v1080_v43 }
  0x5c   : > { %1085 = vmatpush3.bf16.xpose.msk.msra.mxu0 %vm1075_vm6, %v1080_v43 }
  0xc4   : > { %v645_v54 = vpop.xlane.xlu0 %644 }
  0xc8   : > { %v648_v61 = vpop.xlane.xlu0 %647 }
 0x126   : > { %v995_v44 = vpop.f32.mrb[0].mxu0 }
 0x127   : > { %v934_v45 = vmul.f32 -1.442695, %v995_v44  ;;  %v510_v46 = vpop.f32.mrb[1].mxu0 }
 0x128   : > { %v933_v47 = vmul.f32 -1.442695, %v510_v46  ;;  %v1014_v48 = vpop.f32.mrb[0].mxu1 }
 0x129   : > { %1121 = vpow2.f32 %v934_v45  ;;  %v609_v49 = vpop.f32.mrb[1].mxu1 }
 0x12a   : > { %1123 = vpow2.f32 %v933_v47 }
 0x133   : > { %v1122_v50 = vpop.eup %1121 }
 0x134   : > { %v1124_v51 = vpop.eup %1123  ;;  %v625_v52 = vadd.f32 1.0, %v1122_v50 }
 0x135   : > { %v624_v53 = vadd.f32 1.0, %v1124_v51 }
 0x136   : > { %1125 = vrcp.f32 %v625_v52 }
 0x137   : > { %1127 = vrcp.f32 %v624_v53 }
 0x140   : > { %v1126_v55 = vpop.eup %1125 }
 0x141   : > { %v1128_v56 = vpop.eup %1127  ;;  %v631_v57 = vmul.f32 %v1126_v55, %v995_v44 }
 0x142   : > { %v630_v58 = vmul.f32 %v1128_v56, %v510_v46 }
 0x143   : > { %v633_v59 = vmul.f32 %v1014_v48, %v631_v57 }
 0x144   : > { %v632_v60 = vmul.f32 %v630_v58, %v609_v49 }
 0x145   : > { %v650_v63 = vmul.f32 %v648_v61, %v633_v59 }
 0x146   : > { %v649_v62 = vmul.f32 %v645_v54, %v632_v60 }
 0x148   : > { %1023 = vmatprep.mubr.msk.f32.mxu0 %vm653_vm5, %v649_v62 }
 0x149   : > { %1024 = vmatmul.mubr.msk.f32.vlgmr.msra.gmra.mrb[2].mxu0 %vm653_vm5, %v650_v63 }
 0x21c   : > { %v1025_v2 = vpop.f32.mrb[2].mxu0 }
 0x21d   : > { %v748_v3 = vadd.f32 %v1025_v2, %v652_v0  ;;  %v738_v4 = vpop.f32.mrb[3].mxu0 }
 0x21e   : > { %v747_v5 = vadd.f32 %v738_v4, %v651_v1 }
 0x21f   : > { %750 = vst.msk [vmem:[#allocation2 + $0x8] sm:$0xff] %vm413_vm1, %v748_v3 }
 0x220   : > { %749 = vst.msk [vmem:[#allocation2] sm:$0xff] %vm413_vm1, %v747_v5 }
 0x221 PF: > { %p751_p12 = scmp.eq.s32.totalorder %s1187_s26, 7 }
 0x222   : > { %vm758_vm7 = vcmask (%p751_p12), 261120  }
 0x223   : > { %755 = sbr.rel (!%p751_p12) target bundleno = 554 (0x22a), region = 52 }
 0x226   : > { %v757_v7 = vld [vmem:[#allocation2 + $0x8] sm:$0xff] (%p751_p12) }
 0x227   : > { %v756_v6 = vld [vmem:[#allocation2] sm:$0xff] (%p751_p12)  ;;  %760 = vst.msk [vmem:[#allocation5 + $0x8] sm:$0xff] (%p751_p12), %vm758_vm7, %v757_v7 }
 0x228   : > { %759 = vst.msk [vmem:[#allocation5] sm:$0xff] (%p751_p12), %vm758_vm7, %v756_v6 }
 0x22a PF: > { %p1373_p13 = scmp.eq.s32.totalorder %s898_s0, 7  ;;  %s1199_s12 = smov [#allocation5]  }
 0x22b   : > { %s770_s13 = sshll.u32 %s1199_s12, 4  ;;  %s771_s13 = int_to_ptr.vmem [resolvable:$true] %s770_s13 }
 0x22c   : > { %s1141_s14 = scalar_lea.vmem %s771_s13, 256  ;;  %p1148_p3 = scmp.lt.s32.totalorder %s771_s13, %s771_s13 }
 0x22d   : > { %p1142_p0 = scmp.ne.s32.totalorder %s771_s13, %s1141_s14  ;;  %p1149_p4 = scmp.lt.s32.totalorder %s1141_s14, %s1141_s14 }
 0x22f   : > { %p1143_p1 = pnand %p1142_p0, %p1373_p13  ;;  %p1150_p5 = por %p1149_p4, %p1148_p3 }
 0x231   : > { %p1144_p2 = pneg %p1143_p1 }
 0x233   : > { %p1151_p6 = pnand %p1150_p5, %p1144_p2 }
 0x235   : > { %1154 = shalt.err (!%p1151_p6)
}
 0x236   : > { %s1155_s0 = scalar_lea.hbm %s1414_s6, 256 }
 0x237   : > { %p1156_p7 = scmp.ne.s32.totalorder %s1414_s6, %s1155_s0  ;;  %p1161_p10 = scmp.lt.u32.totalorder %s1155_s0, %s1414_s6 }
 0x239   : > { %p1157_p8 = pnand %p1156_p7, %p1373_p13 }
 0x23b   : > { %p1158_p9 = pneg %p1157_p8 }
 0x23d   : > { %p1163_p11 = pnand %p1161_p10, %p1158_p9 }
 0x23f   : > { %1166 = shalt.err (!%p1163_p11)
}
 0x240   : > { %s1200_s20 = smov 128   ;;  %s1201_s21 = smov 8  }
 0x241   : > { %1087 = dma.vmem_to_hbm [thread:$0]  (%p1373_p13), %s771_s13, 256, %s1414_s6, [#allocation6], %s1200_s20, %s1200_s20, %s1201_s21  }
 0x242   : > { %1182 = dma.done.wait (%p1373_p13), [#allocation6], 256  }
 0x243   : > { %1184 = vsyncadd (%p1373_p13), [#allocation6], 4294967040 }
 0x244 PF: > { %s23_s28 = sadd.s32 1, %s1195_s28   ;;  %s1420_s26 = smov %s1191_s27 }
 0x245   : > { %p20_p12 = scmp.ge.s32.totalorder %s23_s28, 10   ;;  %s1421_s27 = smov %s1423_s29 }
 0x247   :  { %22 = sbr.rel (!%p20_p12) target bundleno = 17 (0x11), region = 92 }
 0x24e   :  { %786 = vsyncpa [#allocation6], 1 }
 0x24f   :  { %788 = vsyncpa [#allocation6 + $0x1], 1 }

</bundles_post_ra>
